<compile_context>
chip_gen: v5e
topology: v5e:2x2
jax: 0.10.0
libtpu: 0.0.40
codegen_flags: <defaults>
</compile_context>

<pallas_src>
import jax
import jax.numpy as jnp
from jax.experimental import pallas as pl
from jax.experimental.pallas import tpu as pltpu

LANE = 128
SUBLANE = 8


def _round_up(x, m):
    return ((x + m - 1) // m) * m


# ---------------------------------------------------------------------------
# Fused multi-layer kernel: (Linear [+ cov Linear] + folded-BN bias)
#                           -> optional LayerNorm -> optional ReLU, per layer.
# All layer loops are static (unrolled); intermediates never leave VMEM.
# ---------------------------------------------------------------------------
def _make_fused_kernel(layer_cfg, has_cov, use_activation, use_layer_norm,
                       compute_dtype):
    def kernel(*refs):
        o_ref = refs[-1]
        idx = 0
        x_ref = refs[idx]
        idx += 1
        cov = None
        if has_cov:
            cov = refs[idx][...]          # (TB, P_cov), compute_dtype
            idx += 1
        params = refs[idx:-1]

        h = x_ref[...]                    # (TB, P_in), compute_dtype
        p = 0
        z = None
        for cfg in layer_cfg:
            wx = params[p][...]           # (P_in_i, P_out_i)
            p += 1
            z = jnp.dot(h, wx, preferred_element_type=jnp.float32)
            if cfg["inject"]:
                wc = params[p][...]       # (P_cov, P_out_i)
                p += 1
                z = z + jnp.dot(cov, wc, preferred_element_type=jnp.float32)
            b = params[p][...]            # (1, P_out_i), f32, BN already folded
            p += 1
            z = z + b
            if use_layer_norm:
                # Single-pass mean/var over the *actual* feature count; padded
                # lanes are exactly zero before LN so the sums are unaffected.
                inv_n = 1.0 / cfg["d_out"]
                s1 = jnp.sum(z, axis=-1, keepdims=True)
                s2 = jnp.sum(z * z, axis=-1, keepdims=True)
                mu = s1 * inv_n
                var = jnp.maximum(s2 * inv_n - mu * mu, 0.0)
                z = (z - mu) * jax.lax.rsqrt(var + 1e-5)
            if use_activation:
                z = jnp.maximum(z, 0.0)
            h = z.astype(compute_dtype)   # feed next layer's MXU in bf16/f32
        o_ref[...] = z.astype(o_ref.dtype)

    return kernel


# ---------------------------------------------------------------------------
# FCLayers re-implementation (parameters built deterministically in-script)
# ---------------------------------------------------------------------------
class FCLayersPallas:
    def __init__(self, key, n_in, n_out, n_cat_list=None, n_cont=0, n_layers=1,
                 n_hidden=128, dropout_rate=0.1, use_batch_norm=True,
                 use_layer_norm=False, use_activation=True, bias=True,
                 inject_covariates=True, compute_dtype=jnp.bfloat16):
        self.inject_covariates = inject_covariates
        self.use_activation = use_activation
        self.use_layer_norm = use_layer_norm
        self.use_batch_norm = use_batch_norm
        self.compute_dtype = compute_dtype

        self.n_cat_list = [c if c > 1 else 0 for c in (n_cat_list or [])]
        self.n_cont = n_cont
        self.n_cov = n_cont + sum(self.n_cat_list)
        self.has_cov = self.n_cov > 0

        self.dims = [n_in] + (n_layers - 1) * [n_hidden] + [n_out]
        self.p_dims = [_round_up(d, LANE) for d in self.dims]   # lane-padded
        self.p_cov = _round_up(self.n_cov, LANE) if self.has_cov else 0

        self.raw = []        # un-folded params (f32) for the pure-JAX reference
        self.padded = []     # folded / padded / cast params fed to the kernel
        self.layer_cfg = []

        for i, (din, dout) in enumerate(zip(self.dims[:-1], self.dims[1:])):
            inject_here = self.inject_into_layer(i)
            din_tot = din + self.n_cov * int(inject_here)
            key, kw, kb, kg, kbe, krm, krv = jax.random.split(key, 7)

            # Deterministic synthetic init; weight stored as (in, out) = W^T
            # relative to PyTorch's (out, in) so the hot path is x @ W.
            w_full = (jax.random.normal(kw, (din_tot, dout), jnp.float32)
                      / jnp.sqrt(float(din_tot)))
            b = (jax.random.normal(kb, (1, dout), jnp.float32) * 0.01
                 if bias else jnp.zeros((1, dout), jnp.float32))
            if use_batch_norm:
                gamma = 1.0 + 0.1 * jax.random.normal(kg, (1, dout), jnp.float32)
                beta = 0.1 * jax.random.normal(kbe, (1, dout), jnp.float32)
                rmean = 0.1 * jax.random.normal(krm, (1, dout), jnp.float32)
                rvar = 0.5 + jnp.abs(jax.random.normal(krv, (1, dout), jnp.float32))
            else:
                gamma = jnp.ones((1, dout), jnp.float32)
                beta = jnp.zeros((1, dout), jnp.float32)
                rmean = jnp.zeros((1, dout), jnp.float32)
                rvar = jnp.ones((1, dout), jnp.float32)
            self.raw.append(dict(w=w_full, b=b, gamma=gamma, beta=beta,
                                 rmean=rmean, rvar=rvar))

            # --- Fold eval-mode BatchNorm into the linear: W' = W*s, b' = b*s+t
            if use_batch_norm:
                scale = gamma * jax.lax.rsqrt(rvar + 1e-3)
                shift = beta - rmean * scale
            else:
                scale = jnp.ones((1, dout), jnp.float32)
                shift = jnp.zeros((1, dout), jnp.float32)

            wx = w_full[:din] * scale
            wcov = (w_full[din:] * scale
                    if (inject_here and self.has_cov) else None)
            b_f = b * scale + shift

            # --- Pad to lane-aligned shapes and cast matmul operands.
            pin, pout = self.p_dims[i], self.p_dims[i + 1]
            wx_p = (jnp.zeros((pin, pout), jnp.float32)
                    .at[:din, :dout].set(wx).astype(compute_dtype))
            wc_p = None
            if wcov is not None:
                wc_p = (jnp.zeros((self.p_cov, pout), jnp.float32)
                        .at[:self.n_cov, :dout].set(wcov).astype(compute_dtype))
            b_p = jnp.zeros((1, pout), jnp.float32).at[:, :dout].set(b_f)

            self.padded.append(dict(wx=wx_p, wcov=wc_p, b=b_p))
            self.layer_cfg.append(dict(inject=wc_p is not None, d_out=dout))

    def inject_into_layer(self, layer_num) -> bool:
        return layer_num == 0 or (layer_num > 0 and self.inject_covariates)

    def _cov(self, cat_list, cont):
        parts = []
        if cont is not None:
            parts.append(cont.astype(jnp.float32))
        for n_cat, cat in zip(self.n_cat_list, cat_list):
            if n_cat > 1:
                oh = jax.nn.one_hot(cat.reshape(cat.shape[0]), n_cat,
                                    dtype=jnp.float32)
                parts.append(oh)
        if not parts:
            return None
        return jnp.concatenate(parts, axis=-1)

    # ---------------- Pallas fused forward ----------------
    def forward(self, x, *cat_list, cont=None):
        B = x.shape[0]
        cov = self._cov(cat_list, cont) if self.has_cov else None
        cdt = self.compute_dtype

        TB = min(256, _round_up(max(B, SUBLANE), SUBLANE))   # batch tile
        Bp = _round_up(B, TB)
        pin0, pout = self.p_dims[0], self.p_dims[-1]

        xp = (jnp.zeros((Bp, pin0), cdt)
              .at[:B, :self.dims[0]].set(x.astype(cdt)))
        args = [xp]
        in_specs = [pl.BlockSpec((TB, pin0), lambda i: (i, 0))]

        if self.has_cov:
            covp = (jnp.zeros((Bp, self.p_cov), cdt)
                    .at[:B, :self.n_cov].set(cov.astype(cdt)))
            args.append(covp)
            in_specs.append(pl.BlockSpec((TB, self.p_cov), lambda i: (i, 0)))

        for p in self.padded:
            args.append(p["wx"])
            in_specs.append(pl.BlockSpec(p["wx"].shape, lambda i: (0, 0)))
            if p["wcov"] is not None:
                args.append(p["wcov"])
                in_specs.append(pl.BlockSpec(p["wcov"].shape, lambda i: (0, 0)))
            args.append(p["b"])
            in_specs.append(pl.BlockSpec(p["b"].shape, lambda i: (0, 0)))

        kernel = _make_fused_kernel(self.layer_cfg, self.has_cov,
                                    self.use_activation, self.use_layer_norm,
                                    cdt)

        # --- Cost estimate (helps XLA schedule around the custom call).
        flops = 0
        for i, cfg in enumerate(self.layer_cfg):
            flops += 2 * Bp * self.p_dims[i] * self.p_dims[i + 1]
            if cfg["inject"]:
                flops += 2 * Bp * self.p_cov * self.p_dims[i + 1]
        transcendentals = Bp * len(self.layer_cfg) if self.use_layer_norm else 0
        out_bytes = Bp * pout * 4
        bytes_accessed = int(sum(a.size * a.dtype.itemsize for a in args)
                             + out_bytes)

        # --- Explicit VMEM budget (stay within v7x's 64 MiB physical VMEM).
        itemsz = jnp.dtype(cdt).itemsize
        n_stream = 1 + int(self.has_cov)
        weight_bytes = int(sum(a.size * a.dtype.itemsize
                               for a in args[n_stream:]))
        tile_bytes = (TB * (pin0 + self.p_cov) * itemsz + TB * pout * 4)
        scratch_bytes = TB * max(self.p_dims) * 4 * 4
        vmem_limit = int(min(64 * 1024 * 1024,
                             max(16 * 1024 * 1024,
                                 2 * (weight_bytes + 2 * tile_bytes)
                                 + scratch_bytes)))

        out = pl.pallas_call(
            kernel,
            out_shape=jax.ShapeDtypeStruct((Bp, pout), jnp.float32),
            grid=(Bp // TB,),
            in_specs=in_specs,
            out_specs=pl.BlockSpec((TB, pout), lambda i: (i, 0)),
            compiler_params=pltpu.CompilerParams(
                dimension_semantics=("parallel",),
                vmem_limit_bytes=vmem_limit),
            cost_estimate=pl.CostEstimate(
                flops=flops, transcendentals=transcendentals,
                bytes_accessed=bytes_accessed),
        )(*args)
        return out[:B, :self.dims[-1]]

    # ---------------- Pure-JAX reference (module semantics, f32) ----------------
    def forward_ref(self, x, *cat_list, cont=None):
        cov = self._cov(cat_list, cont) if self.has_cov else None
        h = x.astype(jnp.float32)
        for i, p in enumerate(self.raw):
            hin = h
            if cov is not None and self.inject_into_layer(i):
                hin = jnp.concatenate([h, cov], axis=-1)
            z = hin @ p["w"] + p["b"]
            if self.use_batch_norm:
                z = ((z - p["rmean"]) * jax.lax.rsqrt(p["rvar"] + 1e-3)
                     * p["gamma"] + p["beta"])
            if self.use_layer_norm:
                mu = jnp.mean(z, axis=-1, keepdims=True)
                var = jnp.mean((z - mu) ** 2, axis=-1, keepdims=True)
                z = (z - mu) * jax.lax.rsqrt(var + 1e-5)
            if self.use_activation:
                z = jnp.maximum(z, 0.0)
            h = z
        return h


if __name__ == "__main__":
    key = jax.random.PRNGKey(0)
    k_m1, k_m2, k_x, k_c0, k_c1, k_cont = jax.random.split(key, 6)

    # Small, forward-consistent shapes.
    B, n_in, n_out, n_hidden, n_layers = 8, 32, 16, 64, 2
    n_cat_list, n_cont = [3, 2], 2

    x = jax.random.normal(k_x, (B, n_in), jnp.float32)
    cat0 = jax.random.randint(k_c0, (B, 1), 0, n_cat_list[0], jnp.int32)
    cat1 = jax.random.randint(k_c1, (B, 1), 0, n_cat_list[1], jnp.int32)
    cont = jax.random.normal(k_cont, (B, n_cont), jnp.float32)

    # Config A: default fast path (bf16 matmuls), BN + ReLU, covariates
    # injected into every layer. Tolerance reflects bf16 input quantization.
    model_bf16 = FCLayersPallas(
        k_m1, n_in=n_in, n_out=n_out, n_cat_list=n_cat_list, n_cont=n_cont,
        n_layers=n_layers, n_hidden=n_hidden, dropout_rate=0.1,
        use_batch_norm=True, use_layer_norm=False, use_activation=True,
        bias=True, inject_covariates=True, compute_dtype=jnp.bfloat16)
    out = jax.block_until_ready(model_bf16.forward(x, cat0, cat1, cont=cont))
    ref = model_bf16.forward_ref(x, cat0, cat1, cont=cont)
    assert out.shape == (B, n_out)
    assert jnp.allclose(out, ref, atol=1e-1, rtol=5e-2), \
        "bf16 Pallas vs f32 JAX mismatch"

    # Config B: f32 fallback path with LayerNorm, covariates only in layer 0.
    # Tight tolerance check of the fused kernel math.
    model_f32 = FCLayersPallas(
        k_m2, n_in=n_in, n_out=n_out, n_cat_list=n_cat_list, n_cont=n_cont,
        n_layers=n_layers, n_hidden=n_hidden, dropout_rate=0.1,
        use_batch_norm=True, use_layer_norm=True, use_activation=True,
        bias=True, inject_covariates=False, compute_dtype=jnp.float32)
    out32 = jax.block_until_ready(model_f32.forward(x, cat0, cat1, cont=cont))
    ref32 = model_f32.forward_ref(x, cat0, cat1, cont=cont)
    assert out32.shape == (B, n_out)
    assert jnp.allclose(out32, ref32, atol=1e-4, rtol=1e-4), \
        "f32 Pallas vs JAX mismatch"

    print("KERNEL_OK")
</pallas_src>

<mosaic_0001>
module attributes {stable_mosaic.version = 11 : i64} {
  func.func @kernel(%arg0: i32, %arg1: memref<8x128xbf16, #tpu.memory_space<vmem>>, %arg2: memref<8x128xbf16, #tpu.memory_space<vmem>>, %arg3: memref<128x128xbf16, #tpu.memory_space<vmem>>, %arg4: memref<128x128xbf16, #tpu.memory_space<vmem>>, %arg5: memref<1x128xf32, #tpu.memory_space<vmem>>, %arg6: memref<128x128xbf16, #tpu.memory_space<vmem>>, %arg7: memref<128x128xbf16, #tpu.memory_space<vmem>>, %arg8: memref<1x128xf32, #tpu.memory_space<vmem>>, %arg9: memref<8x128xf32, #tpu.memory_space<vmem>>) attributes {dimension_semantics = [#tpu.dimension_semantics<parallel>], iteration_bounds = array<i64: 1>, scalar_prefetch = 0 : i64, scratch_operands = 0 : i64, tpu.core_type = #tpu.core_type<tc>, window_params = [{transform_indices = @transform_0, window_bounds = array<i64: 8, 128>}, {transform_indices = @transform_1, window_bounds = array<i64: 8, 128>}, {pipeline_mode = #tpu.pipeline_mode<synchronous>, transform_indices = @transform_2, window_bounds = array<i64: 128, 128>}, {pipeline_mode = #tpu.pipeline_mode<synchronous>, transform_indices = @transform_3, window_bounds = array<i64: 128, 128>}, {pipeline_mode = #tpu.pipeline_mode<synchronous>, transform_indices = @transform_4, window_bounds = array<i64: 1, 128>}, {pipeline_mode = #tpu.pipeline_mode<synchronous>, transform_indices = @transform_5, window_bounds = array<i64: 128, 128>}, {pipeline_mode = #tpu.pipeline_mode<synchronous>, transform_indices = @transform_6, window_bounds = array<i64: 128, 128>}, {pipeline_mode = #tpu.pipeline_mode<synchronous>, transform_indices = @transform_7, window_bounds = array<i64: 1, 128>}, {transform_indices = @transform_8, window_bounds = array<i64: 8, 128>}]} {
    %c0 = arith.constant 0 : index
    %c0_0 = arith.constant 0 : index
    %0 = vector.load %arg2[%c0, %c0_0] : memref<8x128xbf16, #tpu.memory_space<vmem>>, vector<8x128xbf16>
    %c0_1 = arith.constant 0 : index
    %c0_2 = arith.constant 0 : index
    %1 = vector.load %arg1[%c0_1, %c0_2] : memref<8x128xbf16, #tpu.memory_space<vmem>>, vector<8x128xbf16>
    %c0_3 = arith.constant 0 : index
    %c0_4 = arith.constant 0 : index
    %2 = vector.load %arg3[%c0_3, %c0_4] : memref<128x128xbf16, #tpu.memory_space<vmem>>, vector<128x128xbf16>
    %cst = arith.constant dense<0.000000e+00> : vector<8x128xf32>
    %3 = tpu.matmul %1, %2, %cst {dimension_numbers = #tpu.dot_dimension_numbers<[1], [0], [0], [1], [0, 0, 1, 1], [], []>} : vector<8x128xbf16>, vector<128x128xbf16>, vector<8x128xf32> -> vector<8x128xf32>
    %c0_5 = arith.constant 0 : index
    %c0_6 = arith.constant 0 : index
    %4 = vector.load %arg4[%c0_5, %c0_6] : memref<128x128xbf16, #tpu.memory_space<vmem>>, vector<128x128xbf16>
    %cst_7 = arith.constant dense<0.000000e+00> : vector<8x128xf32>
    %5 = tpu.matmul %0, %4, %cst_7 {dimension_numbers = #tpu.dot_dimension_numbers<[1], [0], [0], [1], [0, 0, 1, 1], [], []>} : vector<8x128xbf16>, vector<128x128xbf16>, vector<8x128xf32> -> vector<8x128xf32>
    %6 = arith.addf %3, %5 : vector<8x128xf32>
    %c0_8 = arith.constant 0 : index
    %c0_9 = arith.constant 0 : index
    %7 = vector.load %arg5[%c0_8, %c0_9] : memref<1x128xf32, #tpu.memory_space<vmem>>, vector<1x128xf32>
    %8 = vector.broadcast %7 : vector<1x128xf32> to vector<8x128xf32>
    %9 = arith.addf %6, %8 : vector<8x128xf32>
    %cst_10 = arith.constant 0.000000e+00 : f32
    %10 = vector.broadcast %cst_10 : f32 to vector<8x128xf32>
    %11 = arith.maximumf %9, %10 : vector<8x128xf32>
    %12 = arith.truncf %11 : vector<8x128xf32> to vector<8x128xbf16>
    %c0_11 = arith.constant 0 : index
    %c0_12 = arith.constant 0 : index
    %13 = vector.load %arg6[%c0_11, %c0_12] : memref<128x128xbf16, #tpu.memory_space<vmem>>, vector<128x128xbf16>
    %cst_13 = arith.constant dense<0.000000e+00> : vector<8x128xf32>
    %14 = tpu.matmul %12, %13, %cst_13 {dimension_numbers = #tpu.dot_dimension_numbers<[1], [0], [0], [1], [0, 0, 1, 1], [], []>} : vector<8x128xbf16>, vector<128x128xbf16>, vector<8x128xf32> -> vector<8x128xf32>
    %c0_14 = arith.constant 0 : index
    %c0_15 = arith.constant 0 : index
    %15 = vector.load %arg7[%c0_14, %c0_15] : memref<128x128xbf16, #tpu.memory_space<vmem>>, vector<128x128xbf16>
    %cst_16 = arith.constant dense<0.000000e+00> : vector<8x128xf32>
    %16 = tpu.matmul %0, %15, %cst_16 {dimension_numbers = #tpu.dot_dimension_numbers<[1], [0], [0], [1], [0, 0, 1, 1], [], []>} : vector<8x128xbf16>, vector<128x128xbf16>, vector<8x128xf32> -> vector<8x128xf32>
    %17 = arith.addf %14, %16 : vector<8x128xf32>
    %c0_17 = arith.constant 0 : index
    %c0_18 = arith.constant 0 : index
    %18 = vector.load %arg8[%c0_17, %c0_18] : memref<1x128xf32, #tpu.memory_space<vmem>>, vector<1x128xf32>
    %19 = vector.broadcast %18 : vector<1x128xf32> to vector<8x128xf32>
    %20 = arith.addf %17, %19 : vector<8x128xf32>
    %cst_19 = arith.constant 0.000000e+00 : f32
    %21 = vector.broadcast %cst_19 : f32 to vector<8x128xf32>
    %22 = arith.maximumf %20, %21 : vector<8x128xf32>
    %c0_20 = arith.constant 0 : index
    %c0_21 = arith.constant 0 : index
    %23 = vector.load %arg9[%c0_20, %c0_21] : memref<8x128xf32, #tpu.memory_space<vmem>>, vector<8x128xf32>
    tpu.vector_store %arg9[%c0_20, %c0_21], %22 {strides = array<i32>} : memref<8x128xf32, #tpu.memory_space<vmem>>, vector<8x128xf32>,
    return
  }
  func.func @transform_0(%arg0: i32) -> (i32, i32) {
    %c0_i32 = arith.constant 0 : i32
    %c0_i32_0 = arith.constant 0 : i32
    return %arg0, %c0_i32 : i32, i32
  }
  func.func @transform_1(%arg0: i32) -> (i32, i32) {
    %c0_i32 = arith.constant 0 : i32
    %c0_i32_0 = arith.constant 0 : i32
    return %arg0, %c0_i32 : i32, i32
  }
  func.func @transform_2(%arg0: i32) -> (i32, i32) {
    %c0_i32 = arith.constant 0 : i32
    %c0_i32_0 = arith.constant 0 : i32
    %c0_i32_1 = arith.constant 0 : i32
    return %c0_i32, %c0_i32_0 : i32, i32
  }
  func.func @transform_3(%arg0: i32) -> (i32, i32) {
    %c0_i32 = arith.constant 0 : i32
    %c0_i32_0 = arith.constant 0 : i32
    %c0_i32_1 = arith.constant 0 : i32
    return %c0_i32, %c0_i32_0 : i32, i32
  }
  func.func @transform_4(%arg0: i32) -> (i32, i32) {
    %c0_i32 = arith.constant 0 : i32
    %c0_i32_0 = arith.constant 0 : i32
    %c0_i32_1 = arith.constant 0 : i32
    return %c0_i32, %c0_i32_0 : i32, i32
  }
  func.func @transform_5(%arg0: i32) -> (i32, i32) {
    %c0_i32 = arith.constant 0 : i32
    %c0_i32_0 = arith.constant 0 : i32
    %c0_i32_1 = arith.constant 0 : i32
    return %c0_i32, %c0_i32_0 : i32, i32
  }
  func.func @transform_6(%arg0: i32) -> (i32, i32) {
    %c0_i32 = arith.constant 0 : i32
    %c0_i32_0 = arith.constant 0 : i32
    %c0_i32_1 = arith.constant 0 : i32
    return %c0_i32, %c0_i32_0 : i32, i32
  }
  func.func @transform_7(%arg0: i32) -> (i32, i32) {
    %c0_i32 = arith.constant 0 : i32
    %c0_i32_0 = arith.constant 0 : i32
    %c0_i32_1 = arith.constant 0 : i32
    return %c0_i32, %c0_i32_0 : i32, i32
  }
  func.func @transform_8(%arg0: i32) -> (i32, i32) {
    %c0_i32 = arith.constant 0 : i32
    %c0_i32_0 = arith.constant 0 : i32
    return %arg0, %c0_i32 : i32, i32
  }
}

</mosaic_0001>

<bundles_post_ra>
// kernel: tpu_custom_call.1
= control target key start
LH: loop header
LB: loop body
LE: loop exit
PB: predicated region body
PF: predicated region fallthrough
CT: control target
= control target key end

     0   :  { %13 = vsyncpa [#allocation3], 0  ;;  %s894_s0 = inlined_call_operand.hbm [shape: bf16[8,128], index: 0, kind: input, shape index: {}]   ;;  %s895_s1 = inlined_call_operand.hbm [shape: bf16[8,128], index: 1, kind: input, shape index: {}]   ;;  %s896_s2 = inlined_call_operand.hbm [shape: bf16[128,128], index: 2, kind: input, shape index: {}]   ;;  %s897_s3 = inlined_call_operand.hbm [shape: bf16[128,128], index: 3, kind: input, shape index: {}]   ;;  %s898_s4 = inlined_call_operand.vmem [shape: f32[1,128], index: 4, kind: input, shape index: {}]   ;;  %s899_s5 = inlined_call_operand.hbm [shape: bf16[128,128], index: 5, kind: input, shape index: {}]   ;;  %s900_s6 = inlined_call_operand.hbm [shape: bf16[128,128], index: 6, kind: input, shape index: {}]   ;;  %s901_s7 = inlined_call_operand.vmem [shape: f32[1,128], index: 7, kind: input, shape index: {}]   ;;  %s902_s8 = inlined_call_operand.hbm [shape: f32[8,128], index: 8, kind: output, shape index: {}]  }
   0x1   :  { %14 = vsyncpa [#allocation6], 0 }
   0x2   :  { %15 = vsyncpa [#allocation9], 0 }
   0x3   :  { %16 = vsyncpa [#allocation12], 0  ;;  %s34_s29 = sshll.u32 %s895_s1, 4  ;;  %s35_s29 = int_to_ptr.hbm [resolvable:$true] %s34_s29 }
   0x4   :  { %17 = vsyncpa [#allocation4], 0  ;;  %s813_s30 = smov [#allocation5]   ;;  %s57_s12 = sshll.u32 %s897_s3, 4  ;;  %s58_s12 = int_to_ptr.hbm [resolvable:$true] %s57_s12 }
   0x5   :  { %s36_s9 = sshll.u32 %s813_s30, 4  ;;  %s814_s13 = smov [#allocation8]   ;;  %s37_s9 = int_to_ptr.vmem [resolvable:$true] %s36_s9 }
   0x6   :  { %39 = dma.hbm_to_vmem [thread:$0]  %s35_s29, 64, %s37_s9, [#allocation6]  }
   0x7   :  { %s59_s14 = sshll.u32 %s814_s13, 4  ;;  %s23_s17 = sshll.u32 %s894_s0, 4  ;;  %s60_s14 = int_to_ptr.vmem [resolvable:$true] %s59_s14  ;;  %s24_s17 = int_to_ptr.hbm [resolvable:$true] %s23_s17 }
   0x8   :  { %s815_s1 = smov 64   ;;  %s816_s18 = smov 4  }
   0x9   :  { %65 = dma.hbm_to_vmem [thread:$0]  %s58_s12, 1024, %s60_s14, [#allocation9], %s815_s1, %s815_s1, %s816_s18  }
   0xa   :  { %s44_s21 = sshll.u32 %s896_s2, 4  ;;  %s817_s22 = smov [#allocation2]   ;;  %s45_s21 = int_to_ptr.hbm [resolvable:$true] %s44_s21 }
   0xb   :  { %s25_s23 = sshll.u32 %s817_s22, 4  ;;  %s818_s3 = smov [#allocation7]   ;;  %s26_s23 = int_to_ptr.vmem [resolvable:$true] %s25_s23 }
   0xc   :  { %28 = dma.hbm_to_vmem [thread:$0]  %s24_s17, 64, %s26_s23, [#allocation3]  }
   0xd   :  { %s46_s24 = sshll.u32 %s818_s3, 4  ;;  %s72_s0 = sshll.u32 %s899_s5, 4  ;;  %s47_s24 = int_to_ptr.vmem [resolvable:$true] %s46_s24  ;;  %s73_s0 = int_to_ptr.hbm [resolvable:$true] %s72_s0 }
   0xe   :  { %52 = dma.hbm_to_vmem [thread:$0]  %s45_s21, 1024, %s47_s24, [#allocation6], %s815_s1, %s815_s1, %s816_s18  }
   0xf   :  { %s85_s29 = sshll.u32 %s900_s6, 4  ;;  %s819_s30 = smov [#allocation10]   ;;  %s86_s29 = int_to_ptr.hbm [resolvable:$true] %s85_s29 }
  0x10   :  { %s74_s2 = sshll.u32 %s819_s30, 4  ;;  %s820_s9 = smov [#allocation11]   ;;  %s75_s2 = int_to_ptr.vmem [resolvable:$true] %s74_s2 }
  0x11   :  { %80 = dma.hbm_to_vmem [thread:$0]  %s73_s0, 1024, %s75_s2, [#allocation9], %s815_s1, %s815_s1, %s816_s18  }
  0x12   :  { %s87_s10 = sshll.u32 %s820_s9, 4  ;;  %s88_s10 = int_to_ptr.vmem [resolvable:$true] %s87_s10 }
  0x13   :  { %93 = dma.hbm_to_vmem [thread:$0]  %s86_s29, 1024, %s88_s10, [#allocation12], %s815_s1, %s815_s1, %s816_s18  }
  0x14   :  { %803 = dma.done.wait [#allocation3], 64  }
  0x15   :  { %804 = vsyncadd [#allocation3], 4294967232 }
  0x16   :  { %805 = dma.done.wait [#allocation6], 1088  }
  0x17   :  { %806 = vsyncadd [#allocation6], 4294966208 }
  0x18   :  { %807 = dma.done.wait [#allocation9], 2048  }
  0x19   :  { %808 = vsyncadd [#allocation9], 4294965248 }
  0x1a   :  { %809 = dma.done.wait [#allocation12], 1024  }
  0x1b   :  { %810 = vsyncadd [#allocation12], 4294966272  ;;  %v607_v0 = vld [vmem:[#allocation8 + $0x38] sm:$0xff]  ;;  %v606_v2 = vld [vmem:[#allocation8 + $0x30] sm:$0xff]  ;;  %s821_s13 = smov [#allocation13]   ;;  %s451_s16 = sshll.u32 %s902_s8, 4  ;;  %s452_s16 = int_to_ptr.hbm [resolvable:$true] %s451_s16 }
  0x1c   :  { %v599_v1 = vld [vmem:[#allocation7 + $0x38] sm:$0xff]  ;;  %202 = vmatpush.bf16.msra.mxu0 %v607_v0  ;;  %v598_v3 = vld [vmem:[#allocation7 + $0x30] sm:$0xff]  ;;  %v605_v4 = vld [vmem:[#allocation8 + $0x28] sm:$0xff]  ;;  %s449_s14 = sshll.u32 %s821_s13, 4  ;;  %s450_s14 = int_to_ptr.vmem [resolvable:$true] %s449_s14 }
  0x1d   :  { %263 = vmatpush.bf16.msra.mxu1 %v599_v1  ;;  %v597_v5 = vld [vmem:[#allocation7 + $0x28] sm:$0xff]  ;;  %v623_v6 = vld [vmem:[#allocation11 + $0x38] sm:$0xff]  ;;  %v622_v8 = vld [vmem:[#allocation11 + $0x30] sm:$0xff] }
  0x1e   :  { %v615_v7 = vld [vmem:[#allocation10 + $0x38] sm:$0xff]  ;;  %363 = vmatpush.bf16.msra.mxu2 %v623_v6  ;;  %v614_v9 = vld [vmem:[#allocation10 + $0x30] sm:$0xff]  ;;  %v604_v10 = vld [vmem:[#allocation8 + $0x20] sm:$0xff] }
  0x1f   :  { %424 = vmatpush.bf16.msra.mxu3 %v615_v7  ;;  %v596_v11 = vld [vmem:[#allocation7 + $0x20] sm:$0xff]  ;;  %v621_v12 = vld [vmem:[#allocation11 + $0x28] sm:$0xff]  ;;  %v603_v14 = vld [vmem:[#allocation8 + $0x18] sm:$0xff] }
  0x20   :  { %203 = vmatpush.bf16.msra.mxu0 %v606_v2  ;;  %v613_v13 = vld [vmem:[#allocation10 + $0x28] sm:$0xff]  ;;  %v595_v15 = vld [vmem:[#allocation7 + $0x18] sm:$0xff]  ;;  %v620_v16 = vld [vmem:[#allocation11 + $0x20] sm:$0xff] }
  0x21   :  { %264 = vmatpush.bf16.msra.mxu1 %v598_v3  ;;  %v612_v17 = vld [vmem:[#allocation10 + $0x20] sm:$0xff]  ;;  %v602_v18 = vld [vmem:[#allocation8 + $0x10] sm:$0xff]  ;;  %v619_v20 = vld [vmem:[#allocation11 + $0x18] sm:$0xff] }
  0x22   :  { %364 = vmatpush.bf16.msra.mxu2 %v622_v8  ;;  %v594_v19 = vld [vmem:[#allocation7 + $0x10] sm:$0xff]  ;;  %v611_v21 = vld [vmem:[#allocation10 + $0x18] sm:$0xff]  ;;  %v601_v22 = vld [vmem:[#allocation8 + $0x8] sm:$0xff] }
  0x23   :  { %425 = vmatpush.bf16.msra.mxu3 %v614_v9  ;;  %v593_v23 = vld [vmem:[#allocation7 + $0x8] sm:$0xff]  ;;  %v618_v24 = vld [vmem:[#allocation11 + $0x10] sm:$0xff]  ;;  %v600_v26 = vld [vmem:[#allocation8] sm:$0xff] }
  0x24   :  { %204 = vmatpush.bf16.msra.mxu0 %v605_v4  ;;  %v610_v25 = vld [vmem:[#allocation10 + $0x10] sm:$0xff]  ;;  %v592_v27 = vld [vmem:[#allocation7] sm:$0xff]  ;;  %v617_v28 = vld [vmem:[#allocation11 + $0x8] sm:$0xff] }
  0x25   :  { %265 = vmatpush.bf16.msra.mxu1 %v597_v5  ;;  %v120_v29 = vld [vmem:[#allocation5] sm:$0xf]  ;;  %v121_v30 = vld [vmem:[#allocation2] sm:$0xf]  ;;  %v616_v31 = vld [vmem:[#allocation11] sm:$0xff] }
  0x26   :  { %365 = vmatpush.bf16.msra.mxu2 %v621_v12  ;;  %v609_v32 = vld [vmem:[#allocation10 + $0x8] sm:$0xff]  ;;  %v608_v33 = vld [vmem:[#allocation10] sm:$0xff]  ;;  %v633_v34 = vld [vmem:[%s898_s4] ss:$0 sm:$0xff] }
  0x27   :  { %426 = vmatpush.bf16.msra.mxu3 %v613_v13  ;;  %v634_v45 = vld [vmem:[%s901_s7] ss:$0 sm:$0xff] }
  0x28   :  { %205 = vmatpush.bf16.msra.mxu0 %v604_v10 }
  0x29   :  { %266 = vmatpush.bf16.msra.mxu1 %v596_v11 }
  0x2a   :  { %366 = vmatpush.bf16.msra.mxu2 %v620_v16 }
  0x2b   :  { %427 = vmatpush.bf16.msra.mxu3 %v612_v17 }
  0x2c   :  { %206 = vmatpush.bf16.msra.mxu0 %v603_v14 }
  0x2d   :  { %267 = vmatpush.bf16.msra.mxu1 %v595_v15 }
  0x2e   :  { %367 = vmatpush.bf16.msra.mxu2 %v619_v20 }
  0x2f   :  { %428 = vmatpush.bf16.msra.mxu3 %v611_v21 }
  0x30   :  { %207 = vmatpush.bf16.msra.mxu0 %v602_v18 }
  0x31   :  { %268 = vmatpush.bf16.msra.mxu1 %v594_v19 }
  0x32   :  { %368 = vmatpush.bf16.msra.mxu2 %v618_v24 }
  0x33   :  { %429 = vmatpush.bf16.msra.mxu3 %v610_v25 }
  0x34   :  { %208 = vmatpush.bf16.msra.mxu0 %v601_v22 }
  0x35   :  { %269 = vmatpush.bf16.msra.mxu1 %v593_v23 }
  0x36   :  { %369 = vmatpush.bf16.msra.mxu2 %v617_v28 }
  0x37   :  { %430 = vmatpush.bf16.msra.mxu3 %v609_v32 }
  0x38   :  { %209 = vmatpush.bf16.msra.mxu0 %v600_v26 }
  0x39   :  { %270 = vmatpush.bf16.msra.mxu1 %v592_v27 }
  0x3a   :  { %370 = vmatpush.bf16.msra.mxu2 %v616_v31 }
  0x3b   :  { %210 = vmatmul.bf16.vlgmr.msra.gmra.mxu0 %v120_v29  ;;  %431 = vmatpush.bf16.msra.mxu3 %v608_v33 }
  0x3c   :  { %271 = vmatmul.bf16.vlgmr.msra.gmra.mxu1 %v121_v30 }
  0x3d   :  { %371 = vmatmul.bf16.vlgmr.msra.gmra.mxu2 %v120_v29 }
  0xb8   :  { %v211_v35 = vpop.f32.mrf.mxu0 }
  0xb9   :  { %v272_v36 = vpop.f32.mrf.mxu1 }
  0xba   :  { %v273_v37 = vadd.f32 %v272_v36, %v211_v35 }
  0xbc   :  { %v280_v38 = vadd.f32 %v633_v34, %v273_v37 }
  0xbe   :  { %v281_v39 = vmax.f32 %v280_v38, 0.0 }
  0xc0   :  { %v282_v40 = vpack.c.bf16 %v281_v39, %v281_v39  ;;  %v213_v41 = vpop.f32.mrf.mxu0  ;;  %v372_v43 = vpop.f32.mrf.mxu2 }
  0xc1   :  { %v274_v42 = vpop.f32.mrf.mxu1 }
  0xc2   :  { %432 = vmatmul.bf16.vlgmr.msra.gmra.mxu3 %v282_v40 }
  0xc8   :  { %v374_v44 = vpop.f32.mrf.mxu2 }
 0x145   :  { %v433_v46 = vpop.f32.mrf.mxu3 }
 0x146   :  { %v434_v47 = vadd.f32 %v433_v46, %v372_v43 }
 0x148   :  { %v441_v48 = vadd.f32 %v634_v45, %v434_v47 }
 0x14a   :  { %v442_v49 = vmax.f32 %v441_v48, 0.0 }
 0x14c   :  { %443 = vst [vmem:[#allocation13] sm:$0xff] %v442_v49 }
 0x14d   :  { %v435_v50 = vpop.f32.mrf.mxu3  ;;  %454 = dma.vmem_to_hbm [thread:$0]  %s450_s14, 128, %s452_s16, [#allocation4]  }
 0x14e   :  { %811 = dma.done.wait [#allocation4], 128  }
 0x14f   :  { %812 = vsyncadd [#allocation4], 4294967168 }
 0x150   :  { %459 = vsyncpa [#allocation3], 1 }
 0x151   :  { %460 = vsyncpa [#allocation6], 1 }
 0x152   :  { %461 = vsyncpa [#allocation9], 1 }
 0x153   :  { %462 = vsyncpa [#allocation12], 1 }
 0x154   :  { %463 = vsyncpa [#allocation4], 1 }

</bundles_post_ra>
